<compile_context>
chip_gen: v6e
topology: v6e:2x2x1
jax: 0.10.0
libtpu: 0.0.40
codegen_flags: <defaults>
</compile_context>

<pallas_src>
import math

import jax
import jax.numpy as jnp
from jax.experimental import pallas as pl
from jax.experimental.pallas import tpu as pltpu


def _resolve_target_shape(total, batch, shape):
    """Resolve a torch.view-style target shape (supports a single -1)."""
    rest = total // batch
    shape = tuple(int(s) for s in shape)
    if -1 in shape:
        idx = shape.index(-1)
        known = 1
        for s in shape[:idx] + shape[idx + 1:]:
            known *= s
        assert known > 0 and rest % known == 0, "invalid -1 in reshape"
        shape = shape[:idx] + (rest // known,) + shape[idx + 1:]
    assert math.prod(shape) == rest, (
        f"cannot reshape batch rows of {rest} elements into {shape}")
    return shape


def _dma_copy_kernel(x_hbm, o_hbm, sem):
    # Single whole-array HBM->HBM DMA: no VMEM staging, no vld/vst slot work,
    # no grid overhead.  Runs at DMA/HBM-bandwidth roofline.
    cp = pltpu.make_async_copy(x_hbm, o_hbm, sem)
    cp.start()
    cp.wait()


def _materialized_copy(x):
    """Identity copy of x into a fresh HBM buffer via one DMA."""
    nbytes = x.size * x.dtype.itemsize
    return pl.pallas_call(
        _dma_copy_kernel,
        out_shape=jax.ShapeDtypeStruct(x.shape, x.dtype),
        in_specs=[pl.BlockSpec(memory_space=pl.ANY)],
        out_specs=pl.BlockSpec(memory_space=pl.ANY),
        scratch_shapes=[pltpu.SemaphoreType.DMA(())],
        cost_estimate=pl.CostEstimate(
            flops=0, transcendentals=0, bytes_accessed=2 * nbytes),
        compiler_params=pltpu.CompilerParams(has_side_effects=True),
    )(x)


def batch_reshape(x, shape, *, copy=False):
    """Pallas/JAX equivalent of BatchReshape: x.reshape(x.shape[0], *shape).

    copy=False (default): metadata-only reshape -- free, matches torch .view
        for contiguous inputs (no data movement, no kernel launched).
    copy=True: materialize a fresh buffer via a single HBM->HBM DMA kernel;
        the target shape itself is still applied as free metadata.
    """
    batch = x.shape[0]
    tail = _resolve_target_shape(x.size, batch, shape)
    if copy:
        x = _materialized_copy(x)
    # TODO(synk): torch .view aliases storage; JAX arrays are immutable, so
    # the free-reshape path is the closest (and fastest) equivalent.
    return x.reshape((batch,) + tail)


class BatchReshape:
    """Mirror of the PyTorch module's constructor semantics."""

    def __init__(self, *args):
        if isinstance(args[0], tuple):
            assert len(args) == 1
            self.shape = args[0]
        else:
            self.shape = args

    def __call__(self, x, *, copy=False):
        return batch_reshape(x, self.shape, copy=copy)


if __name__ == "__main__":
    key = jax.random.PRNGKey(0)
    k1, k2 = jax.random.split(key)

    # BatchReshape(64, 16): (2, 4, 16, 16) -> (2, 64, 16).
    x = jax.random.normal(k1, (2, 4, 16, 16), dtype=jnp.float32)
    mod = BatchReshape(64, 16)

    # Default (performant) path: free metadata reshape, no kernel launched.
    y = jax.block_until_ready(mod(x))
    assert y.shape == (2, 64, 16)
    assert jnp.array_equal(y, x.reshape(2, 64, 16)), "free path mismatch"

    # Explicit fresh-buffer path: single HBM->HBM DMA Pallas kernel.
    y_copy = jax.block_until_ready(mod(x, copy=True))
    assert y_copy.shape == (2, 64, 16)
    assert jnp.array_equal(y_copy, x.reshape(2, 64, 16)), "DMA path mismatch"

    # BatchReshape((-1,)): per-batch flatten, tuple-style constructor, also
    # through the DMA-copy kernel.
    x2 = jax.random.normal(k2, (2, 8, 32), dtype=jnp.float32)
    y_flat = jax.block_until_ready(BatchReshape((-1,))(x2, copy=True))
    assert y_flat.shape == (2, 256)
    assert jnp.array_equal(y_flat, x2.reshape(2, -1)), "flatten mismatch"

    print("KERNEL_OK")
</pallas_src>

<mosaic_0001>
module attributes {stable_mosaic.version = 11 : i64} {
  func.func @_dma_copy_kernel(%arg0: memref<2x4x16x16xf32, #tpu.memory_space<any>>, %arg1: memref<2x4x16x16xf32, #tpu.memory_space<any>>, %arg2: memref<!tpu.dma_semaphore, #tpu.memory_space<semaphore_mem>>) attributes {dimension_semantics = [], scalar_prefetch = 0 : i64, scratch_operands = 1 : i64, tpu.core_type = #tpu.core_type<tc>} {
    tpu.enqueue_dma source(%arg0 : memref<2x4x16x16xf32, #tpu.memory_space<any>>) target(%arg1 : memref<2x4x16x16xf32, #tpu.memory_space<any>>) target_semaphore(%arg2 : memref<!tpu.dma_semaphore, #tpu.memory_space<semaphore_mem>>)
    tpu.wait_dma2 semaphore(%arg2 : memref<!tpu.dma_semaphore, #tpu.memory_space<semaphore_mem>>) src(%arg0 : memref<2x4x16x16xf32, #tpu.memory_space<any>>) dst(%arg1 : memref<2x4x16x16xf32, #tpu.memory_space<any>>)
    return
  }
}

</mosaic_0001>

<bundles_post_ra>
// kernel: tpu_custom_call.1
= control target key start
LH: loop header
LB: loop body
LE: loop exit
PB: predicated region body
PF: predicated region fallthrough
CT: control target
= control target key end

     0   :  { %s30_s6 = smov [#allocation2]   ;;  %s31_s7 = smov 131072   ;;  %s49_s0 = inlined_call_operand.hbm [shape: f32[2,4,16,16], index: 0, kind: input, shape index: {}]   ;;  %s50_s1 = inlined_call_operand.hbm [shape: f32[2,4,16,16], index: 1, kind: output, shape index: {}]  }
   0x1   :  { %s32_s8 = smov 0  }
   0x2   :  { %12 = dma.general %s49_s0, 2048, %s50_s1, %s30_s6, %s31_s7, [#allocation4], %s32_s8, 0  }
   0x3   :  { %28 = dma.done.wait [#allocation2], 2048 }
   0x4   :  { %29 = vsyncadd [#allocation2], 4294965248 }
   0x5   :  { %18 = vsyncmov [#allocation2] }
   0x8   :  { %s19_s13 = vpop.sfrf %18 }
   0x9   :  { %p24_p0 = scmp.ne.s32.totalorder %s19_s13, 0 }
   0xb   :  { %23 = shalt.err (%p24_p0)  }

</bundles_post_ra>
